<compile_context>
chip_gen: v7x
topology: tpu7x:2x2x1
jax: 0.10.0
libtpu: 0.0.40
codegen_flags: <defaults>
</compile_context>

<pallas_src>
import jax
import jax.numpy as jnp
from jax.experimental import pallas as pl
from jax.experimental.pallas import tpu as pltpu


# ---------------------------------------------------------------------------
# Fused kernel: whole MLP in one body
# ---------------------------------------------------------------------------
def _make_fused_mlp_kernel(n_blocks):
    """Builds kernel(x, W0, b0, ..., W_{L-1}, b_{L-1}, w_head_row, b_head, out)."""

    def kernel(*refs):
        x_ref, o_ref = refs[0], refs[-1]
        x = x_ref[...]                     # (tb, F) f32
        p = 1
        for _ in range(n_blocks):
            w = refs[p][...]               # (in, h)  bf16 -- BN of previous block folded in
            b = refs[p + 1][...]           # (1, h)   f32
            p += 2
            # MXU in bf16, f32 accumulation; bias-add / ReLU epilogue in f32.
            x = jnp.maximum(
                jnp.dot(x.astype(w.dtype), w,
                        preferred_element_type=jnp.float32) + b,
                0.0)
        wh = refs[p][...]                  # (1, h) head weight stored as a row (f32)
        bh = refs[p + 1][...]              # (1, 1) f32
        # out_features == 1: row-wise multiply + lane reduce instead of a skinny MXU matmul.
        y = jnp.sum(x * wh, axis=-1, keepdims=True)          # (tb, 1)
        y = y.reshape(1, -1) + bh                             # (1, tb) lane-dense row
        o_ref[...] = y.reshape(o_ref.shape).astype(o_ref.dtype)

    return kernel


def _vmem_limit_bytes(x_tile_bytes, param_bytes, out_tile_bytes):
    """Footprint-derived scoped-VMEM limit with headroom, safe on v5e/v6e/v7x."""
    need = 2 * x_tile_bytes + param_bytes + 2 * out_tile_bytes
    need = int(need * 1.5) + (4 << 20)             # relayout / scratch headroom
    return int(min(max(need, 32 << 20), 48 << 20))  # <= 48 MiB fits v7x's 64 MiB VMEM


def _pick_batch_block(B):
    """>=2 roughly balanced, 128-aligned tiles (v7x megacore); 0 means gridless."""
    if B <= 256:
        return 0
    half = (pl.cdiv(B, 2) // 128) * 128
    return int(min(512, max(128, half)))


def fused_mlp_forward(x, params, *, batch_block=None):
    """Single-pallas_call forward of the whole (folded) MLP. Returns (B, 1)."""
    B, F = x.shape
    n_blocks = len(params["blocks"])

    flat = []
    for blk in params["blocks"]:
        flat += [blk["w"], blk["b"]]
    flat += [params["head"]["w"], params["head"]["b"]]
    param_bytes = sum(int(a.size) * a.dtype.itemsize for a in flat)

    kernel = _make_fused_mlp_kernel(n_blocks)

    if batch_block is None:
        batch_block = _pick_batch_block(B)

    # ---------------- gridless path: tiny batch, everything resident ----------------
    if batch_block == 0 or B <= batch_block:
        limit = _vmem_limit_bytes(B * F * 4, param_bytes, B * 4)
        vmem = pl.BlockSpec(memory_space=pltpu.MemorySpace.VMEM)
        out = pl.pallas_call(
            kernel,
            out_shape=jax.ShapeDtypeStruct((1, B), jnp.float32),
            in_specs=[vmem] * (1 + len(flat)),
            out_specs=vmem,
            compiler_params=pltpu.CompilerParams(vmem_limit_bytes=limit),
        )(x, *flat)
        return out.reshape(-1, 1)

    # ---------------- tiled path: batch over a "parallel" grid ----------------------
    grid_n = pl.cdiv(B, batch_block)
    B_pad = grid_n * batch_block
    if B_pad != B:
        # Pad ragged tail with zero rows; their outputs are computed then sliced off.
        x = jnp.pad(x, ((0, B_pad - B), (0, 0)))

    limit = _vmem_limit_bytes(batch_block * F * 4, param_bytes, batch_block * 4)

    in_specs = [pl.BlockSpec((batch_block, F), lambda i: (i, 0))]
    for a in flat:
        # Grid-invariant parameters: constant index_map, DMA'd once, SINGLE-buffered
        # (default Buffered(2) would allocate a dead second copy of every layer).
        in_specs.append(
            pl.BlockSpec(a.shape, lambda i: (0, 0), pipeline_mode=pl.Buffered(1)))
    # Lane-dense output: each grid step writes an unmasked (1, batch_block) row slab.
    out_specs = pl.BlockSpec((1, batch_block), lambda i: (0, i))

    out = pl.pallas_call(
        kernel,
        out_shape=jax.ShapeDtypeStruct((1, B_pad), jnp.float32),
        grid=(grid_n,),
        in_specs=in_specs,
        out_specs=out_specs,
        compiler_params=pltpu.CompilerParams(
            dimension_semantics=("parallel",),
            vmem_limit_bytes=limit,
        ),
    )(x, *flat)
    return out.reshape(-1, 1)[:B]


# ---------------------------------------------------------------------------
# Parameter construction (deterministic synthetic) + host-side BN folding
# ---------------------------------------------------------------------------
def init_raw_params(key, i, h, hidden_layers, eps=1e-5):
    """Raw per-layer params, mirroring the torch module's shapes (eval-mode BN)."""
    blocks = []
    in_dim = i
    for _ in range(hidden_layers + 1):
        key, kw, kb, kg, kbeta, km, kv = jax.random.split(key, 7)
        w = 0.1 * jax.random.normal(kw, (in_dim, h), jnp.float32)   # (in, out)
        b = 0.1 * jax.random.normal(kb, (h,), jnp.float32)
        gamma = 1.0 + 0.1 * jax.random.normal(kg, (h,), jnp.float32)
        beta = 0.1 * jax.random.normal(kbeta, (h,), jnp.float32)
        running_mean = 0.1 * jax.random.normal(km, (h,), jnp.float32)
        running_var = jnp.abs(jax.random.normal(kv, (h,), jnp.float32)) + 0.5
        scale = gamma / jnp.sqrt(running_var + eps)          # eval-mode BN as affine
        shift = beta - running_mean * scale
        blocks.append(dict(w=w, b=b, scale=scale, shift=shift))
        in_dim = h
    key, kw, kb = jax.random.split(key, 3)
    head = dict(w=0.1 * jax.random.normal(kw, (h, 1), jnp.float32),
                b=0.1 * jax.random.normal(kb, (1,), jnp.float32))
    return blocks, head


def fold_params(raw_blocks, raw_head, weight_dtype=jnp.bfloat16):
    """Fold block k's BN affine into block k+1's Linear (and into the head).

    Folding is done in f32 (exact), then block weights are cast to `weight_dtype`
    for the MXU; biases and the width-1 head stay f32 (VPU epilogue).
    """
    blocks = []
    prev_scale = prev_shift = None
    for blk in raw_blocks:
        w, b = blk["w"], blk["b"]
        if prev_scale is not None:
            b = b + prev_shift @ w                 # b' = b + shift_{k-1} @ W
            w = prev_scale[:, None] * w            # W' = scale_{k-1}[:,None] * W
        blocks.append(dict(w=w.astype(weight_dtype),
                           b=b.reshape(1, -1).astype(jnp.float32)))
        prev_scale, prev_shift = blk["scale"], blk["shift"]
    wh, bh = raw_head["w"], raw_head["b"]
    bh = bh + prev_shift @ wh                      # (1,)
    wh = prev_scale[:, None] * wh                  # (h, 1)
    head = dict(w=wh.reshape(1, -1).astype(jnp.float32),   # stored as a (1, h) f32 row
                b=bh.reshape(1, 1).astype(jnp.float32))
    return dict(blocks=blocks, head=head)


def reference_forward(x, raw_blocks, raw_head):
    """Pure-JAX f32 eval-mode reference (un-folded) for correctness checking."""
    for blk in raw_blocks:
        y = jnp.maximum(x @ blk["w"] + blk["b"], 0.0)    # relu(Linear(x))
        x = y * blk["scale"] + blk["shift"]              # BatchNorm1d (running stats)
        # dropout: identity in eval mode
    return x @ raw_head["w"] + raw_head["b"]


# ---------------------------------------------------------------------------
if __name__ == "__main__":
    # Module hyper-params (small, consistent with the forward pass):
    i, h, hidden_layers = 16, 32, 2

    key = jax.random.PRNGKey(0)
    key, kx_small, kx_big = jax.random.split(key, 3)

    raw_blocks, raw_head = init_raw_params(key, i, h, hidden_layers)
    params = fold_params(raw_blocks, raw_head)

    fwd = jax.jit(fused_mlp_forward)

    # 1) Small batch -> gridless whole-batch-resident path.
    x_small = jax.random.normal(kx_small, (8, i), jnp.float32)
    out_small = jax.block_until_ready(fwd(x_small, params))
    assert out_small.shape == (8, 1), out_small.shape
    assert out_small.dtype == jnp.float32
    ref_small = reference_forward(x_small, raw_blocks, raw_head)
    assert jnp.allclose(out_small, ref_small, atol=2e-2, rtol=2e-2), (out_small, ref_small)

    # 2) Ragged larger batch -> padded, tiled "parallel" grid path
    #    (exercises Buffered(1) params, lane-dense out tiles, tail padding).
    x_big = jax.random.normal(kx_big, (640, i), jnp.float32)
    out_big = jax.block_until_ready(fwd(x_big, params))
    assert out_big.shape == (640, 1), out_big.shape
    ref_big = reference_forward(x_big, raw_blocks, raw_head)
    assert jnp.allclose(out_big, ref_big, atol=2e-2, rtol=2e-2), (out_big, ref_big)

    print("KERNEL_OK")
</pallas_src>

<mosaic_0001>
module attributes {stable_mosaic.version = 11 : i64} {
  func.func @kernel(%arg0: memref<8x16xf32, #tpu.memory_space<vmem>>, %arg1: memref<16x32xbf16, #tpu.memory_space<vmem>>, %arg2: memref<1x32xf32, #tpu.memory_space<vmem>>, %arg3: memref<32x32xbf16, #tpu.memory_space<vmem>>, %arg4: memref<1x32xf32, #tpu.memory_space<vmem>>, %arg5: memref<32x32xbf16, #tpu.memory_space<vmem>>, %arg6: memref<1x32xf32, #tpu.memory_space<vmem>>, %arg7: memref<1x32xf32, #tpu.memory_space<vmem>>, %arg8: memref<1x1xf32, #tpu.memory_space<vmem>>, %arg9: memref<1x8xf32, #tpu.memory_space<vmem>>) attributes {dimension_semantics = [], scalar_prefetch = 0 : i64, scratch_operands = 0 : i64, tpu.core_type = #tpu.core_type<tc>} {
    %c0 = arith.constant 0 : index
    %c0_0 = arith.constant 0 : index
    %0 = vector.load %arg0[%c0, %c0_0] : memref<8x16xf32, #tpu.memory_space<vmem>>, vector<8x16xf32>
    %c0_1 = arith.constant 0 : index
    %c0_2 = arith.constant 0 : index
    %1 = vector.load %arg1[%c0_1, %c0_2] : memref<16x32xbf16, #tpu.memory_space<vmem>>, vector<16x32xbf16>
    %c0_3 = arith.constant 0 : index
    %c0_4 = arith.constant 0 : index
    %2 = vector.load %arg2[%c0_3, %c0_4] : memref<1x32xf32, #tpu.memory_space<vmem>>, vector<1x32xf32>
    %3 = arith.truncf %0 : vector<8x16xf32> to vector<8x16xbf16>
    %cst = arith.constant dense<0.000000e+00> : vector<8x32xf32>
    %4 = tpu.matmul %3, %1, %cst {dimension_numbers = #tpu.dot_dimension_numbers<[1], [0], [0], [1], [0, 0, 1, 1], [], []>} : vector<8x16xbf16>, vector<16x32xbf16>, vector<8x32xf32> -> vector<8x32xf32>
    %5 = vector.broadcast %2 : vector<1x32xf32> to vector<8x32xf32>
    %6 = arith.addf %4, %5 : vector<8x32xf32>
    %cst_5 = arith.constant 0.000000e+00 : f32
    %7 = vector.broadcast %cst_5 : f32 to vector<8x32xf32>
    %8 = arith.maximumf %6, %7 : vector<8x32xf32>
    %c0_6 = arith.constant 0 : index
    %c0_7 = arith.constant 0 : index
    %9 = vector.load %arg3[%c0_6, %c0_7] : memref<32x32xbf16, #tpu.memory_space<vmem>>, vector<32x32xbf16>
    %c0_8 = arith.constant 0 : index
    %c0_9 = arith.constant 0 : index
    %10 = vector.load %arg4[%c0_8, %c0_9] : memref<1x32xf32, #tpu.memory_space<vmem>>, vector<1x32xf32>
    %11 = arith.truncf %8 : vector<8x32xf32> to vector<8x32xbf16>
    %cst_10 = arith.constant dense<0.000000e+00> : vector<8x32xf32>
    %12 = tpu.matmul %11, %9, %cst_10 {dimension_numbers = #tpu.dot_dimension_numbers<[1], [0], [0], [1], [0, 0, 1, 1], [], []>} : vector<8x32xbf16>, vector<32x32xbf16>, vector<8x32xf32> -> vector<8x32xf32>
    %13 = vector.broadcast %10 : vector<1x32xf32> to vector<8x32xf32>
    %14 = arith.addf %12, %13 : vector<8x32xf32>
    %cst_11 = arith.constant 0.000000e+00 : f32
    %15 = vector.broadcast %cst_11 : f32 to vector<8x32xf32>
    %16 = arith.maximumf %14, %15 : vector<8x32xf32>
    %c0_12 = arith.constant 0 : index
    %c0_13 = arith.constant 0 : index
    %17 = vector.load %arg5[%c0_12, %c0_13] : memref<32x32xbf16, #tpu.memory_space<vmem>>, vector<32x32xbf16>
    %c0_14 = arith.constant 0 : index
    %c0_15 = arith.constant 0 : index
    %18 = vector.load %arg6[%c0_14, %c0_15] : memref<1x32xf32, #tpu.memory_space<vmem>>, vector<1x32xf32>
    %19 = arith.truncf %16 : vector<8x32xf32> to vector<8x32xbf16>
    %cst_16 = arith.constant dense<0.000000e+00> : vector<8x32xf32>
    %20 = tpu.matmul %19, %17, %cst_16 {dimension_numbers = #tpu.dot_dimension_numbers<[1], [0], [0], [1], [0, 0, 1, 1], [], []>} : vector<8x32xbf16>, vector<32x32xbf16>, vector<8x32xf32> -> vector<8x32xf32>
    %21 = vector.broadcast %18 : vector<1x32xf32> to vector<8x32xf32>
    %22 = arith.addf %20, %21 : vector<8x32xf32>
    %cst_17 = arith.constant 0.000000e+00 : f32
    %23 = vector.broadcast %cst_17 : f32 to vector<8x32xf32>
    %24 = arith.maximumf %22, %23 : vector<8x32xf32>
    %c0_18 = arith.constant 0 : index
    %c0_19 = arith.constant 0 : index
    %25 = vector.load %arg7[%c0_18, %c0_19] : memref<1x32xf32, #tpu.memory_space<vmem>>, vector<1x32xf32>
    %c0_20 = arith.constant 0 : index
    %c0_21 = arith.constant 0 : index
    %26 = vector.load %arg8[%c0_20, %c0_21] : memref<1x1xf32, #tpu.memory_space<vmem>>, vector<1x1xf32>
    %27 = vector.broadcast %25 : vector<1x32xf32> to vector<8x32xf32>
    %28 = arith.mulf %24, %27 : vector<8x32xf32>
    %cst_22 = arith.constant dense<0.000000e+00> : vector<8xf32>
    %29 = vector.multi_reduction <add>, %28, %cst_22 [1] : vector<8x32xf32> to vector<8xf32>
    %30 = vector.shape_cast %29 : vector<8xf32> to vector<8x1xf32>
    %31 = vector.shape_cast %30 : vector<8x1xf32> to vector<1x8xf32>
    %32 = vector.broadcast %26 : vector<1x1xf32> to vector<1x8xf32>
    %33 = arith.addf %31, %32 : vector<1x8xf32>
    %c0_23 = arith.constant 0 : index
    %c0_24 = arith.constant 0 : index
    %34 = vector.load %arg9[%c0_23, %c0_24] : memref<1x8xf32, #tpu.memory_space<vmem>>, vector<1x8xf32>
    tpu.vector_store %arg9[%c0_23, %c0_24], %33 {strides = array<i32>} : memref<1x8xf32, #tpu.memory_space<vmem>>, vector<1x8xf32>,
    return
  }
}

</mosaic_0001>

<bundles_post_ra>
// kernel: fused_mlp_forward.1
= control target key start
LH: loop header
LB: loop body
LE: loop exit
PB: predicated region body
PF: predicated region fallthrough
CT: control target
= control target key end

     0   :  { %s610_s0 = inlined_call_operand.hbm [shape: f32[8,16], index: 0, kind: input, shape index: {}]   ;;  %s611_s1 = inlined_call_operand.hbm [shape: bf16[16,32], index: 1, kind: input, shape index: {}]   ;;  %s612_s2 = inlined_call_operand.vmem [shape: f32[1,32], index: 2, kind: input, shape index: {}]   ;;  %s613_s3 = inlined_call_operand.vmem [shape: bf16[32,32], index: 3, kind: input, shape index: {}]   ;;  %s614_s4 = inlined_call_operand.vmem [shape: f32[1,32], index: 4, kind: input, shape index: {}]   ;;  %s615_s5 = inlined_call_operand.hbm [shape: bf16[32,32], index: 5, kind: input, shape index: {}]   ;;  %s616_s6 = inlined_call_operand.vmem [shape: f32[1,32], index: 6, kind: input, shape index: {}]   ;;  %s617_s7 = inlined_call_operand.vmem [shape: f32[1,32], index: 7, kind: input, shape index: {}]   ;;  %s618_s8 = inlined_call_operand.<no memory space> [shape: f32[1,1], index: 8, kind: input, shape index: {}]   ;;  %s619_s9 = inlined_call_operand.hbm [shape: f32[1,8], index: 9, kind: output, shape index: {}]  }
   0x1   :  { %v14_v0 = vstv %s618_s8 }
   0x2   :  { %15 = vst [vmem:[#allocation2] sm:$0x1] %v14_v0 }
   0x3   :  { %16 = vsyncpa [#allocation4], 0 }
   0x4   :  { %17 = vsyncpa [#allocation7], 0 }
   0x5   :  { %18 = vsyncpa [#allocation5], 0  ;;  %s473_s11 = smov [#allocation6]   ;;  %s379_s15 = scalar_lea.hbm %s611_s1, 128 }
   0x6   :  { %s34_s12 = sshll.u32 %s473_s11, 4  ;;  %p380_p0 = scmp.ne.s32.totalorder %s611_s1, %s379_s15  ;;  %s35_s12 = int_to_ptr.vmem [resolvable:$true] %s34_s12 }
   0x7   :  { %p383_p1 = scmp.lt.u32.totalorder %s379_s15, %s611_s1 }
   0x9   :  { %p385_p2 = pnand %p383_p1, %p380_p0 }
   0xb   :  { %388 = shalt.err (!%p385_p2)
}
   0xc   :  { %s389_s8 = scalar_lea.vmem %s35_s12, 128  ;;  %p394_p4 = scmp.lt.s32.totalorder %s35_s12, %s35_s12 }
   0xd   :  { %p390_p3 = scmp.ne.s32.totalorder %s35_s12, %s389_s8  ;;  %p395_p5 = scmp.lt.s32.totalorder %s389_s8, %s389_s8 }
   0xf   :  { %p396_p6 = por %p395_p5, %p394_p4 }
  0x11   :  { %p397_p7 = pnand %p396_p6, %p390_p3 }
  0x13   :  { %400 = shalt.err (!%p397_p7)
}
  0x14   :  { %s474_s20 = smov 64   ;;  %s475_s21 = smov 4  }
  0x15   :  { %40 = dma.hbm_to_vmem [thread:$0]  %s611_s1, 128, %s35_s12, [#allocation7], %s474_s20, %s474_s20, %s475_s21  }
  0x16   :  { %s476_s24 = smov [#allocation3]   ;;  %s477_s26 = smov [#allocation8]  }
  0x17   :  { %s25_s25 = sshll.u32 %s476_s24, 4  ;;  %s52_s27 = sshll.u32 %s477_s26, 4  ;;  %s26_s25 = int_to_ptr.vmem [resolvable:$true] %s25_s25  ;;  %s53_s27 = int_to_ptr.vmem [resolvable:$true] %s52_s27 }
  0x18   :  { %s401_s30 = scalar_lea.hbm %s610_s0, 128 }
  0x19   :  { %p402_p8 = scmp.ne.s32.totalorder %s610_s0, %s401_s30  ;;  %p405_p9 = scmp.lt.u32.totalorder %s401_s30, %s610_s0 }
  0x1b   :  { %p407_p10 = pnand %p405_p9, %p402_p8 }
  0x1d   :  { %410 = shalt.err (!%p407_p10)
}
  0x1e   :  { %s411_s1 = scalar_lea.vmem %s26_s25, 128  ;;  %p416_p12 = scmp.lt.s32.totalorder %s26_s25, %s26_s25 }
  0x1f   :  { %p412_p11 = scmp.ne.s32.totalorder %s26_s25, %s411_s1  ;;  %p417_p13 = scmp.lt.s32.totalorder %s411_s1, %s411_s1 }
  0x21   :  { %p418_p0 = por %p417_p13, %p416_p12 }
  0x23   :  { %p419_p1 = pnand %p418_p0, %p412_p11 }
  0x25   :  { %422 = shalt.err (!%p419_p1)
}
  0x26   :  { %28 = dma.hbm_to_vmem [thread:$0]  %s610_s0, 128, %s26_s25, [#allocation4]  }
  0x27   :  { %s423_s18 = scalar_lea.hbm %s615_s5, 256 }
  0x28   :  { %p424_p2 = scmp.ne.s32.totalorder %s615_s5, %s423_s18  ;;  %p427_p3 = scmp.lt.u32.totalorder %s423_s18, %s615_s5 }
  0x2a   :  { %p429_p4 = pnand %p427_p3, %p424_p2 }
  0x2c   :  { %432 = shalt.err (!%p429_p4)
}
  0x2d   :  { %s433_s24 = scalar_lea.vmem %s53_s27, 256  ;;  %p438_p6 = scmp.lt.s32.totalorder %s53_s27, %s53_s27 }
  0x2e   :  { %p434_p5 = scmp.ne.s32.totalorder %s53_s27, %s433_s24  ;;  %p439_p7 = scmp.lt.s32.totalorder %s433_s24, %s433_s24 }
  0x30   :  { %p440_p8 = por %p439_p7, %p438_p6 }
  0x32   :  { %p441_p9 = pnand %p440_p8, %p434_p5 }
  0x34   :  { %444 = shalt.err (!%p441_p9)
}
  0x35   :  { %58 = dma.hbm_to_vmem [thread:$0]  %s615_s5, 256, %s53_s27, [#allocation7], %s474_s20, %s474_s20, %s475_s21  }
  0x36   :  { %467 = dma.done.wait [#allocation4], 128  }
  0x37   :  { %468 = vsyncadd [#allocation4], 4294967168 }
  0x38   :  { %469 = dma.done.wait [#allocation7], 384  }
  0x39   :  { %470 = vsyncadd [#allocation7], 4294966912  ;;  %v478_v1 = vmov 0.0   ;;  %vm479_vm0 = vmmov 0   ;;  %v374_v2 = vld [vmem:[#allocation6] sm:$0xff]   ;;  %v75_v3 = vld [vmem:[#allocation3] sm:$0xff]  ;;  %v291_v37 = vlaneseq }
  0x3a   :  { %342 = vmatprep.subr.bf16.mxu0 %v478_v1  ;;  %344 = vmatprep.mubr.msk.bf16.mxu0 %vm479_vm0, %v478_v1  ;;  %vm92_vm1 = vcmask 130048   ;;  %v79_v4 = vpack.c.bf16 %v75_v3, %v75_v3  ;;  %v375_v5 = vld [vmem:[%s613_s3] sm:$0xff]   ;;  %v376_v6 = vld [vmem:[%s613_s3 + $0x8] sm:$0xff]   ;;  %v377_v7 = vld [vmem:[#allocation8] sm:$0xff]   ;;  %vm161_vm2 = vcmask 261120   ;;  %v480_v25 = vmov 0  }
  0x3b   :  { %348 = vmatprep.subr.bf16.mxu1 %v478_v1  ;;  %352 = vmatprep.mubr.msk.bf16.mxu1 %vm479_vm0, %v478_v1  ;;  %v322_v8 = vld [vmem:[%s612_s2] ss:$0 sm:$0xff]  ;;  %v292_v38 = vshrl.u32 %v291_v37, 7  ;;  %v298_v41 = vand.u32 127, %v291_v37  ;;  %vm304_vm3 = vcmask 57344  }
  0x3c   :  { %343 = vmatpush3.bf16.msra.mxu0 %v374_v2  ;;  %349 = vmatpush3.bf16.msra.mxu1 %v375_v5  ;;  %v378_v16 = vld [vmem:[#allocation8 + $0x8] sm:$0xff]  }
  0x3d   :  { %356 = vmatprep.subr.bf16.mxu0 %v478_v1  ;;  %350 = vmatprep.subr.bf16.mxu1 %v478_v1  ;;  %v325_v17 = vld [vmem:[%s614_s4] ss:$0 sm:$0xff]  ;;  %v293_v40 = vsub.s32 0, %v292_v38  ;;  %v301_v43 = vsub.s32 %v298_v41, %v292_v38 }
  0x3e   :  { %373 = vset.pattern.permute.xlu0 %v480_v25  ;;  %v329_v26 = vld [vmem:[%s616_s6] ss:$0 sm:$0xff]  ;;  %s481_s6 = smov [#allocation9]  }
  0x3f   :  { %345 = vmatmul.mubr.msk.bf16.vlgmr.msra.gmra.mrb[0].mxu0 %vm92_vm1, %v79_v4  ;;  %v333_v31 = vld [vmem:[%s617_s7] ss:$0 sm:$0xff]  ;;  %s312_s11 = sshll.u32 %s481_s6, 4  ;;  %s313_s11 = int_to_ptr.vmem [resolvable:$true] %s312_s11 }
  0x40   :  { %360 = vmatprep.mubr.msk.bf16.mxu0 %vm479_vm0, %v478_v1  ;;  %351 = vmatpush3.bf16.msra.mxu1 %v376_v6  ;;  %v275_v36 = vld [vmem:[#allocation2] sm:$0x1]  ;;  %s445_s7 = scalar_lea.vmem %s313_s11, 16  ;;  %s449_s13 = scalar_lea.vmem %s313_s11, 32 }
  0x41   :  { %357 = vmatpush3.bf16.msra.mxu0 %v377_v7  ;;  %p446_p10 = scmp.ne.s32.totalorder %s313_s11, %s445_s7  ;;  %p450_p11 = scmp.lt.s32.totalorder %s313_s11, %s313_s11 }
  0x42   :  { %358 = vmatprep.subr.bf16.mxu0 %v478_v1  ;;  %p451_p12 = scmp.lt.s32.totalorder %s449_s13, %s445_s7 }
  0x44   :  { %p452_p13 = por %p451_p12, %p450_p11 }
  0x45   :  { %359 = vmatpush3.bf16.msra.mxu0 %v378_v16 }
  0x46   :  { %p453_p0 = pnand %p452_p13, %p446_p10 }
 0x112   :  { %v130_v9 = vpop.f32.mrb[0].mxu0 }
 0x113   :  { %v131_v10 = vadd.f32 %v322_v8, %v130_v9  ;;  %v346_v11 = vpop.f32.mrb[1].mxu0 }
 0x114   :  { %v133_v12 = vpop.f32.mrb[2].mxu0 }
 0x115   :  { %v136_v13 = vmax.f32 %v131_v10, 0.0  ;;  %v347_v14 = vpop.f32.mrb[3].mxu0 }
 0x117   :  { %v142_v15 = vpack.c.bf16 %v136_v13, %v136_v13 }
 0x119   :  { %353 = vmatmul.mubr.msk.bf16.vlgmr.msra.gmra.mrb[0].mxu1 %vm161_vm2, %v142_v15 }
 0x1ec   :  { %v199_v18 = vpop.f32.mrb[0].mxu1 }
 0x1ed   :  { %v200_v19 = vadd.f32 %v325_v17, %v199_v18  ;;  %v354_v20 = vpop.f32.mrb[1].mxu1 }
 0x1ee   :  { %v202_v21 = vpop.f32.mrb[2].mxu1 }
 0x1ef   :  { %v205_v22 = vmax.f32 %v200_v19, 0.0  ;;  %v355_v23 = vpop.f32.mrb[3].mxu1 }
 0x1f1   :  { %v211_v24 = vpack.c.bf16 %v205_v22, %v205_v22 }
 0x1f3   :  { %361 = vmatmul.mubr.msk.bf16.vlgmr.msra.gmra.mrb[4].mxu0 %vm161_vm2, %v211_v24 }
 0x2c6   :  { %v267_v27 = vpop.f32.mrb[4].mxu0 }
 0x2c7   :  { %v268_v28 = vadd.f32 %v329_v26, %v267_v27  ;;  %v362_v29 = vpop.f32.mrb[5].mxu0 }
 0x2c8   :  { %v270_v30 = vpop.f32.mrb[6].mxu0 }
 0x2c9   :  { %v273_v32 = vmax.f32 %v268_v28, 0.0  ;;  %v363_v33 = vpop.f32.mrb[7].mxu0 }
 0x2cb   :  { %v282_v34 = vmul.f32 %v333_v31, %v273_v32 }
 0x2cd   :  { %v283_v35 = vsel %vm161_vm2, %v282_v34, 0.0 }
 0x2ce   :  { %284 = vadd.xlane.f32.xlu0 %v283_v35 }
 0x2e4   :  { %288 = vperm.xlu0 %373, %v275_v36  }
 0x35b   :  { %v285_v39 = vpop.xlane.xlu0 %284 }
 0x363   :  { %v289_v42 = vpop.permute.xlu0 %288 }
 0x364   :  { %v294_v44 = vrot.slane %v289_v42, %v293_v40 }
 0x366   :  { %v295_v45 = vadd.f32 %v294_v44, %v285_v39 }
 0x368   :  { %v302_v46 = vrot.slane %v295_v45, %v301_v43 }
 0x36a   :  { %305 = vst.msk [vmem:[#allocation9] sm:$0x1] %vm304_vm3, %v302_v46 }
 0x36b   :  { %456 = shalt.err (!%p453_p0)
}
 0x36c   :  { %s457_s12 = scalar_lea.hbm %s619_s9, 16 }
 0x36d   :  { %p458_p1 = scmp.ne.s32.totalorder %s619_s9, %s457_s12  ;;  %p461_p2 = scmp.lt.u32.totalorder %s457_s12, %s619_s9 }
 0x36f   :  { %p463_p3 = pnand %p461_p2, %p458_p1 }
 0x371   :  { %466 = shalt.err (!%p463_p3)
}
 0x372   :  { %315 = dma.vmem_to_hbm [thread:$0]  %s313_s11, 16, %s619_s9, [#allocation5]  }
 0x373   :  { %471 = dma.done.wait [#allocation5], 16  }
 0x374   :  { %472 = vsyncadd [#allocation5], 4294967280 }
 0x375   :  { %319 = vsyncpa [#allocation4], 1 }
 0x376   :  { %320 = vsyncpa [#allocation7], 1 }
 0x377   :  { %321 = vsyncpa [#allocation5], 1 }

</bundles_post_ra>
